<compile_context>
chip_gen: v6e
topology: v6e:2x2x1
jax: 0.10.0
libtpu: 0.0.40
codegen_flags: <defaults>
</compile_context>

<pallas_src>
import jax
import jax.numpy as jnp
from jax.experimental import pallas as pl
from jax.experimental.pallas import tpu as pltpu


def _round_up(x, m):
    return ((x + m - 1) // m) * m


def _pick_tile(dim, target, align):
    """Largest multiple of `align` that divides `dim` and is <= target.

    `dim` must already be a multiple of `align`; falls back to `align`.
    """
    if dim <= target:
        return dim
    t = (target // align) * align
    while t >= align:
        if dim % t == 0:
            return t
        t -= align
    return align


def _vmem_limit(footprint_bytes):
    # footprint already counts double buffers; add headroom but stay below the
    # v7x physical VMEM (64 MiB per TC). v5e/v6e have 128 MiB physical.
    return int(min(max(footprint_bytes + footprint_bytes // 2 + (2 << 20),
                       32 << 20),
                   56 << 20))


# ---------------------------------------------------------------------------
# Kernels
# ---------------------------------------------------------------------------
def _linear_kernel_acc(x_ref, w_ref, b_ref, o_ref, acc_ref):
    # Tiled over (N, M, K); K is the last ("arbitrary") grid axis.
    # x_ref: (tm, tk)  w_ref: (tk, tn)  b_ref: (1, tn)  o_ref: (tm, tn)
    # acc_ref: (tm, tn) f32 scratch, resident across the K axis.
    k = pl.program_id(2)
    prod = jnp.dot(x_ref[...], w_ref[...], preferred_element_type=jnp.float32)

    @pl.when(k == 0)
    def _():
        acc_ref[...] = prod            # direct assign: no zero-init round trip

    @pl.when(k > 0)
    def _():
        acc_ref[...] += prod

    @pl.when(k == pl.num_programs(2) - 1)
    def _():
        # bias applied exactly once in the epilogue; activation = Identity.
        o_ref[...] = (acc_ref[...] + b_ref[...].astype(jnp.float32)).astype(
            o_ref.dtype)


def _linear_kernel_noacc(x_ref, w_ref, b_ref, o_ref):
    # Single contraction step: dot + bias straight to the output tile.
    o_ref[...] = (
        jnp.dot(x_ref[...], w_ref[...], preferred_element_type=jnp.float32)
        + b_ref[...].astype(jnp.float32)
    ).astype(o_ref.dtype)


# ---------------------------------------------------------------------------
# Parameter init / one-time prep (out of the hot path)
# ---------------------------------------------------------------------------
def init_linear_params(key, input_size, output_size, std=0.1):
    # Matches nn.init.trunc_normal_(weight, std=0.1) (truncation at +/- 2*std)
    # and nn.init.constant_(bias, 0.0).
    w = jax.random.truncated_normal(
        key, -2.0, 2.0, (output_size, input_size), dtype=jnp.float32) * std
    b = jnp.zeros((output_size,), dtype=jnp.float32)
    return w, b


def prepare_linear_params(weight, bias, compute_dtype=jnp.bfloat16):
    """One-time prep: transpose to [K, N], pad to multiples of 128 and cast to
    the MXU compute dtype (bf16 by default). Bias stays f32 (added in f32 in
    the epilogue). Done at init so no per-call weight transpose/pad/cast."""
    N, K = weight.shape
    Kp = _round_up(K, 128)
    Np = _round_up(N, 128)
    w_t = weight.T.astype(compute_dtype)
    w_t = jnp.pad(w_t, ((0, Kp - K), (0, Np - N)))
    if bias is None:
        bias = jnp.zeros((N,), jnp.float32)
    b2d = jnp.pad(bias.astype(jnp.float32), (0, Np - N)).reshape(1, Np)
    return w_t, b2d


# ---------------------------------------------------------------------------
# Forward wrapper
# ---------------------------------------------------------------------------
def linear_pallas(x, weight_t, bias2d, *, out_features,
                  tm=1024, tn=1024, tk=512,
                  max_resident_weight_bytes=6 << 20):
    """y = x @ W^T + b (activation = nn.Identity), tiled Pallas TPU kernel.

    x:         [M, K]   activations; output keeps x.dtype
    weight_t:  [Kp, Np] from prepare_linear_params (pre-transposed, 128-padded,
                        compute-dtype)
    bias2d:    [1, Np]  f32, 128-padded
    out_features: original (unpadded) N
    """
    M, K = x.shape
    Kp, Np = weight_t.shape
    N = out_features
    assert K <= Kp and Kp - K < 128, "weight_t K-padding inconsistent with x"
    assert N <= Np
    out_dtype = x.dtype
    cbytes = jnp.dtype(weight_t.dtype).itemsize
    obytes = jnp.dtype(out_dtype).itemsize

    # bf16 packs two rows per sublane -> 16-row granularity on M; f32 -> 8.
    m_align = 16 if cbytes < 4 else 8

    # Cast activations to the compute dtype of the prepared weight (bf16 path).
    if x.dtype != weight_t.dtype:
        x = x.astype(weight_t.dtype)

    # Minimal padding only (sublane on M, lane on K); tiles below are chosen as
    # divisors of the padded dims, so no further padding is needed.
    Mp = _round_up(M, m_align)
    if (Mp, Kp) != (M, K):
        x = jnp.pad(x, ((0, Mp - M), (0, Kp - K)))

    weight_bytes = Kp * Np * cbytes
    resident = (weight_bytes <= max_resident_weight_bytes
                and Kp <= 2048 and Np <= 2048)

    if resident:
        # ---- weight-stationary fast path: weight lives in VMEM, grid over M.
        tm_r = _pick_tile(Mp, min(tm, 256), m_align)
        grid = (Mp // tm_r,)
        footprint = (2 * tm_r * Kp * cbytes + 2 * weight_bytes
                     + 2 * tm_r * Np * obytes + 2 * Np * 4)
        cost = pl.CostEstimate(
            flops=2 * Mp * Np * Kp, transcendentals=0,
            bytes_accessed=(Mp * Kp * cbytes + weight_bytes + Np * 4
                            + Mp * Np * obytes))
        out_padded = pl.pallas_call(
            _linear_kernel_noacc,
            out_shape=jax.ShapeDtypeStruct((Mp, Np), out_dtype),
            grid_spec=pltpu.PrefetchScalarGridSpec(
                num_scalar_prefetch=0,
                grid=grid,
                in_specs=[
                    pl.BlockSpec((tm_r, Kp), lambda i: (i, 0)),   # x row tile
                    pl.BlockSpec((Kp, Np), lambda i: (0, 0)),     # resident W
                    pl.BlockSpec((1, Np), lambda i: (0, 0)),      # resident b
                ],
                out_specs=pl.BlockSpec((tm_r, Np), lambda i: (i, 0)),
            ),
            compiler_params=pltpu.CompilerParams(
                dimension_semantics=("parallel",),
                vmem_limit_bytes=_vmem_limit(footprint),
            ),
            cost_estimate=cost,
        )(x, weight_t, bias2d)
    else:
        # ---- general tiled path: grid (N, M, K), K last ("arbitrary").
        tm_ = _pick_tile(Mp, tm, m_align)
        tn_ = _pick_tile(Np, tn, 128)
        tk_ = _pick_tile(Kp, tk, 128)
        gj, gi, gk = Np // tn_, Mp // tm_, Kp // tk_
        footprint = (2 * tm_ * tk_ * cbytes + 2 * tk_ * tn_ * cbytes
                     + 2 * tm_ * tn_ * obytes + 2 * tn_ * 4
                     + (tm_ * tn_ * 4 if gk > 1 else 0))
        cost = pl.CostEstimate(
            flops=2 * Mp * Np * Kp, transcendentals=0,
            bytes_accessed=(Mp * Kp * cbytes * gj     # x re-streamed per N slab
                            + Kp * Np * cbytes * gi   # W re-streamed per M slab
                            + Np * 4 + Mp * Np * obytes))

        if gk > 1:
            cparams = pltpu.CompilerParams(
                dimension_semantics=("parallel", "parallel", "arbitrary"),
                vmem_limit_bytes=_vmem_limit(footprint),
            )
            out_padded = pl.pallas_call(
                _linear_kernel_acc,
                out_shape=jax.ShapeDtypeStruct((Mp, Np), out_dtype),
                grid_spec=pltpu.PrefetchScalarGridSpec(
                    num_scalar_prefetch=0,
                    grid=(gj, gi, gk),
                    in_specs=[
                        pl.BlockSpec((tm_, tk_), lambda j, i, k: (i, k)),
                        pl.BlockSpec((tk_, tn_), lambda j, i, k: (k, j)),
                        pl.BlockSpec((1, tn_), lambda j, i, k: (0, j)),
                    ],
                    out_specs=pl.BlockSpec((tm_, tn_), lambda j, i, k: (i, j)),
                    scratch_shapes=[pltpu.VMEM((tm_, tn_), jnp.float32)],
                ),
                compiler_params=cparams,
                cost_estimate=cost,
            )(x, weight_t, bias2d)
        else:
            # single K step: skip the f32 scratch entirely.
            cparams = pltpu.CompilerParams(
                dimension_semantics=("parallel", "parallel"),
                vmem_limit_bytes=_vmem_limit(footprint),
            )
            out_padded = pl.pallas_call(
                _linear_kernel_noacc,
                out_shape=jax.ShapeDtypeStruct((Mp, Np), out_dtype),
                grid_spec=pltpu.PrefetchScalarGridSpec(
                    num_scalar_prefetch=0,
                    grid=(gj, gi),
                    in_specs=[
                        pl.BlockSpec((tm_, tk_), lambda j, i: (i, 0)),
                        pl.BlockSpec((tk_, tn_), lambda j, i: (0, j)),
                        pl.BlockSpec((1, tn_), lambda j, i: (0, j)),
                    ],
                    out_specs=pl.BlockSpec((tm_, tn_), lambda j, i: (i, j)),
                ),
                compiler_params=cparams,
                cost_estimate=cost,
            )(x, weight_t, bias2d)

    if (Mp, Np) != (M, N):
        out_padded = out_padded[:M, :N]
    return out_padded


# ---------------------------------------------------------------------------
# Demo / self-check
# ---------------------------------------------------------------------------
if __name__ == "__main__":
    batch = 8
    input_size = 32
    output_size = 64

    key = jax.random.PRNGKey(0)
    kx, kw, kx2, kx3 = jax.random.split(key, 4)

    # --- module-sized problem: exercises the weight-resident fast path -------
    x = jax.random.normal(kx, (batch, input_size), dtype=jnp.float32)
    w, b = init_linear_params(kw, input_size, output_size)
    w_t, b2d = prepare_linear_params(w, b)          # one-time prep (bf16 weight)

    y = linear_pallas(x, w_t, b2d, out_features=output_size)
    y = jax.block_until_ready(y)
    y_ref = x @ w.T + b
    assert y.shape == (batch, output_size)
    # bf16 compute (f32 accumulation) -> loosened tolerance vs f32 reference.
    assert jnp.allclose(y, y_ref, atol=2e-2, rtol=2e-2), \
        float(jnp.max(jnp.abs(y - y_ref)))

    # --- multi-K-step accumulator path (forced off the resident fast path) ---
    M2, K2, N2 = 128, 1024, 384
    x2 = jax.random.normal(kx2, (M2, K2), dtype=jnp.float32)
    w2, b2 = init_linear_params(jax.random.fold_in(kw, 1), K2, N2)
    w2_t, b2_2d = prepare_linear_params(w2, b2)
    y2 = linear_pallas(x2, w2_t, b2_2d, out_features=N2,
                       tm=128, tn=256, tk=512,
                       max_resident_weight_bytes=0)
    y2 = jax.block_until_ready(y2)
    y2_ref = x2 @ w2.T + b2
    rel2 = jnp.max(jnp.abs(y2 - y2_ref)) / (jnp.max(jnp.abs(y2_ref)) + 1e-6)
    assert y2.shape == (M2, N2) and rel2 < 2e-2, float(rel2)

    # --- single-K-step (no-scratch) tiled path --------------------------------
    M3, K3, N3 = 32, 256, 256
    x3 = jax.random.normal(kx3, (M3, K3), dtype=jnp.float32)
    w3, b3 = init_linear_params(jax.random.fold_in(kw, 2), K3, N3)
    w3_t, b3_2d = prepare_linear_params(w3, b3)
    y3 = linear_pallas(x3, w3_t, b3_2d, out_features=N3,
                       max_resident_weight_bytes=0)
    y3 = jax.block_until_ready(y3)
    y3_ref = x3 @ w3.T + b3
    rel3 = jnp.max(jnp.abs(y3 - y3_ref)) / (jnp.max(jnp.abs(y3_ref)) + 1e-6)
    assert y3.shape == (M3, N3) and rel3 < 2e-2, float(rel3)

    print("KERNEL_OK")
</pallas_src>

<mosaic_0001>
module attributes {stable_mosaic.version = 11 : i64} {
  func.func @_linear_kernel_noacc(%arg0: i32, %arg1: memref<16x128xbf16, #tpu.memory_space<vmem>>, %arg2: memref<128x128xbf16, #tpu.memory_space<vmem>>, %arg3: memref<1x128xf32, #tpu.memory_space<vmem>>, %arg4: memref<16x128xf32, #tpu.memory_space<vmem>>) attributes {dimension_semantics = [#tpu.dimension_semantics<parallel>], iteration_bounds = array<i64: 1>, scalar_prefetch = 0 : i64, scratch_operands = 0 : i64, tpu.core_type = #tpu.core_type<tc>, window_params = [{transform_indices = @transform_0, window_bounds = array<i64: 16, 128>}, {pipeline_mode = #tpu.pipeline_mode<synchronous>, transform_indices = @transform_1, window_bounds = array<i64: 128, 128>}, {pipeline_mode = #tpu.pipeline_mode<synchronous>, transform_indices = @transform_2, window_bounds = array<i64: 1, 128>}, {transform_indices = @transform_3, window_bounds = array<i64: 16, 128>}]} {
    %c0 = arith.constant 0 : index
    %c0_0 = arith.constant 0 : index
    %0 = vector.load %arg1[%c0, %c0_0] : memref<16x128xbf16, #tpu.memory_space<vmem>>, vector<16x128xbf16>
    %c0_1 = arith.constant 0 : index
    %c0_2 = arith.constant 0 : index
    %1 = vector.load %arg2[%c0_1, %c0_2] : memref<128x128xbf16, #tpu.memory_space<vmem>>, vector<128x128xbf16>
    %cst = arith.constant dense<0.000000e+00> : vector<16x128xf32>
    %2 = tpu.matmul %0, %1, %cst {dimension_numbers = #tpu.dot_dimension_numbers<[1], [0], [0], [1], [0, 0, 1, 1], [], []>} : vector<16x128xbf16>, vector<128x128xbf16>, vector<16x128xf32> -> vector<16x128xf32>
    %c0_3 = arith.constant 0 : index
    %c0_4 = arith.constant 0 : index
    %3 = vector.load %arg3[%c0_3, %c0_4] : memref<1x128xf32, #tpu.memory_space<vmem>>, vector<1x128xf32>
    %4 = vector.broadcast %3 : vector<1x128xf32> to vector<16x128xf32>
    %5 = arith.addf %2, %4 : vector<16x128xf32>
    %c0_5 = arith.constant 0 : index
    %c0_6 = arith.constant 0 : index
    %6 = vector.load %arg4[%c0_5, %c0_6] : memref<16x128xf32, #tpu.memory_space<vmem>>, vector<16x128xf32>
    tpu.vector_store %arg4[%c0_5, %c0_6], %5 {strides = array<i32>} : memref<16x128xf32, #tpu.memory_space<vmem>>, vector<16x128xf32>,
    return
  }
  func.func @transform_0(%arg0: i32) -> (i32, i32) {
    %c0_i32 = arith.constant 0 : i32
    %c0_i32_0 = arith.constant 0 : i32
    return %arg0, %c0_i32 : i32, i32
  }
  func.func @transform_1(%arg0: i32) -> (i32, i32) {
    %c0_i32 = arith.constant 0 : i32
    %c0_i32_0 = arith.constant 0 : i32
    %c0_i32_1 = arith.constant 0 : i32
    return %c0_i32, %c0_i32_0 : i32, i32
  }
  func.func @transform_2(%arg0: i32) -> (i32, i32) {
    %c0_i32 = arith.constant 0 : i32
    %c0_i32_0 = arith.constant 0 : i32
    %c0_i32_1 = arith.constant 0 : i32
    return %c0_i32, %c0_i32_0 : i32, i32
  }
  func.func @transform_3(%arg0: i32) -> (i32, i32) {
    %c0_i32 = arith.constant 0 : i32
    %c0_i32_0 = arith.constant 0 : i32
    return %arg0, %c0_i32 : i32, i32
  }
}

</mosaic_0001>

<bundles_post_ra>
// kernel: tpu_custom_call.1
= control target key start
LH: loop header
LB: loop body
LE: loop exit
PB: predicated region body
PF: predicated region fallthrough
CT: control target
= control target key end

     0   :  { %8 = vsyncpa [#allocation3], 0  ;;  %s348_s0 = inlined_call_operand.hbm [shape: bf16[16,128], index: 0, kind: input, shape index: {}]   ;;  %s349_s1 = inlined_call_operand.hbm [shape: bf16[128,128], index: 1, kind: input, shape index: {}]   ;;  %s350_s2 = inlined_call_operand.vmem [shape: f32[1,128], index: 2, kind: input, shape index: {}]   ;;  %s351_s3 = inlined_call_operand.hbm [shape: f32[16,128], index: 3, kind: output, shape index: {}]  }
   0x1   :  { %9 = vsyncpa [#allocation6], 0 }
   0x2   :  { %10 = vsyncpa [#allocation4], 0  ;;  %s307_s12 = smov [#allocation2]  }
   0x3   :  { %s16_s13 = sshll.u32 %s307_s12, 4  ;;  %s17_s13 = int_to_ptr.vmem [resolvable:$true] %s16_s13 }
   0x4   :  { %s249_s14 = scalar_lea.vmem %s17_s13, 128  ;;  %p254_p1 = scmp.lt.s32.totalorder %s17_s13, %s17_s13 }
   0x5   :  { %p250_p0 = scmp.ne.s32.totalorder %s17_s13, %s249_s14  ;;  %p255_p2 = scmp.lt.s32.totalorder %s249_s14, %s249_s14 }
   0x7   :  { %p256_p3 = por %p255_p2, %p254_p1 }
   0x9   :  { %p257_p4 = pnand %p256_p3, %p250_p0 }
   0xb   :  { %260 = shalt.err (!%p257_p4)
}
   0xc   :  { %s308_s15 = smov 64   ;;  %s309_s16 = smov 4  }
   0xd   :  { %22 = dma.hbm_to_vmem [thread:$0]  %s348_s0, 128, %s17_s13, [#allocation3], %s308_s15, %s308_s15, %s309_s16  }
   0xe   :  { %s310_s19 = smov [#allocation5]  }
   0xf   :  { %s28_s20 = sshll.u32 %s310_s19, 4  ;;  %s29_s20 = int_to_ptr.vmem [resolvable:$true] %s28_s20 }
  0x10   :  { %s269_s21 = scalar_lea.vmem %s29_s20, 1024  ;;  %p274_p6 = scmp.lt.s32.totalorder %s29_s20, %s29_s20 }
  0x11   :  { %p270_p5 = scmp.ne.s32.totalorder %s29_s20, %s269_s21  ;;  %p275_p7 = scmp.lt.s32.totalorder %s269_s21, %s269_s21 }
  0x13   :  { %p276_p8 = por %p275_p7, %p274_p6 }
  0x15   :  { %p277_p9 = pnand %p276_p8, %p270_p5 }
  0x17   :  { %280 = shalt.err (!%p277_p9)
}
  0x18   :  { %34 = dma.hbm_to_vmem [thread:$0]  %s349_s1, 1024, %s29_s20, [#allocation6], %s308_s15, %s308_s15, %s309_s16  }
  0x19   :  { %301 = dma.done.wait [#allocation3], 128  }
  0x1a   :  { %302 = vsyncadd [#allocation3], 4294967168 }
  0x1b   :  { %303 = dma.done.wait [#allocation6], 1024  }
  0x1c   :  { %304 = vsyncadd [#allocation6], 4294966272  ;;  %v311_v0 = vmov 0.0   ;;  %vm312_vm0 = vmmov 0   ;;  %v232_v1 = vld [vmem:[#allocation5 + $0x38] sm:$0xff]   ;;  %v233_v2 = vld [vmem:[#allocation5 + $0x30] sm:$0xff]  }
  0x1d   :  { %203 = vmatprep.subr.bf16.mxu0 %v311_v0  ;;  %219 = vmatprep.mubr.msk.bf16.mxu0 %vm312_vm0, %v311_v0  ;;  %v234_v3 = vld [vmem:[#allocation5 + $0x28] sm:$0xff]   ;;  %v235_v4 = vld [vmem:[#allocation5 + $0x20] sm:$0xff]   ;;  %v236_v5 = vld [vmem:[#allocation5 + $0x18] sm:$0xff]   ;;  %s313_s24 = smov [#allocation7]  }
  0x1e   :  { %204 = vmatpush3.bf16.msra.mxu0 %v232_v1  ;;  %v237_v6 = vld [vmem:[#allocation5 + $0x10] sm:$0xff]   ;;  %v238_v7 = vld [vmem:[#allocation5 + $0x8] sm:$0xff]   ;;  %v239_v8 = vld [vmem:[#allocation5] sm:$0xff]   ;;  %s171_s25 = sshll.u32 %s313_s24, 4  ;;  %s172_s25 = int_to_ptr.vmem [resolvable:$true] %s171_s25 }
  0x1f   :  { %205 = vmatprep.subr.bf16.mxu0 %v311_v0  ;;  %v240_v9 = vld [vmem:[#allocation2] sm:$0xff]   ;;  %s281_s26 = scalar_lea.vmem %s172_s25, 256  ;;  %p286_p11 = scmp.lt.s32.totalorder %s172_s25, %s172_s25 }
  0x20   :  { %v184_v10 = vld [vmem:[%s350_s2] ss:$0 sm:$0xff]  ;;  %p282_p10 = scmp.ne.s32.totalorder %s172_s25, %s281_s26  ;;  %p287_p12 = scmp.lt.s32.totalorder %s281_s26, %s281_s26 }
  0x22   :  { %206 = vmatpush3.bf16.msra.mxu0 %v233_v2  ;;  %p288_p13 = por %p287_p12, %p286_p11 }
  0x23   :  { %207 = vmatprep.subr.bf16.mxu0 %v311_v0 }
  0x24   :  { %p289_p0 = pnand %p288_p13, %p282_p10 }
  0x26   :  { %208 = vmatpush3.bf16.msra.mxu0 %v234_v3 }
  0x27   :  { %209 = vmatprep.subr.bf16.mxu0 %v311_v0 }
  0x2a   :  { %210 = vmatpush3.bf16.msra.mxu0 %v235_v4 }
  0x2b   :  { %211 = vmatprep.subr.bf16.mxu0 %v311_v0 }
  0x2e   :  { %212 = vmatpush3.bf16.msra.mxu0 %v236_v5 }
  0x2f   :  { %213 = vmatprep.subr.bf16.mxu0 %v311_v0 }
  0x32   :  { %214 = vmatpush3.bf16.msra.mxu0 %v237_v6 }
  0x33   :  { %215 = vmatprep.subr.bf16.mxu0 %v311_v0 }
  0x36   :  { %216 = vmatpush3.bf16.msra.mxu0 %v238_v7 }
  0x37   :  { %217 = vmatprep.subr.bf16.mxu0 %v311_v0 }
  0x3a   :  { %218 = vmatpush3.bf16.msra.mxu0 %v239_v8 }
  0x3d   :  { %220 = vmatmul.mubr.bf16.vlgmr.msra.gmra.mxu0 %v240_v9 }
  0xfd   :  { %v157_v11 = vpop.f32.mrf.mxu0 }
  0xfe   :  { %v158_v12 = vadd.f32 %v184_v10, %v157_v11 }
  0xff   :  { %v221_v13 = vpop.f32.mrf.mxu0 }
 0x100   :  { %164 = vst [vmem:[#allocation7] sm:$0xff] %v158_v12 }
 0x101   :  { %v160_v14 = vpop.f32.mrf.mxu0 }
 0x102   :  { %v161_v15 = vadd.f32 %v184_v10, %v160_v14 }
 0x103   :  { %v222_v16 = vpop.f32.mrf.mxu0 }
 0x104   :  { %165 = vst [vmem:[#allocation7 + $0x8] sm:$0xff] %v161_v15 }
 0x105   :  { %292 = shalt.err (!%p289_p0)
}
 0x106   :  { %s314_s27 = smov 128   ;;  %s315_s2 = smov 8  }
 0x107   :  { %177 = dma.vmem_to_hbm [thread:$0]  %s172_s25, 256, %s351_s3, [#allocation4], %s314_s27, %s314_s27, %s315_s2  }
 0x108   :  { %305 = dma.done.wait [#allocation4], 256  }
 0x109   :  { %306 = vsyncadd [#allocation4], 4294967040 }
 0x10a   :  { %181 = vsyncpa [#allocation3], 1 }
 0x10b   :  { %182 = vsyncpa [#allocation6], 1 }
 0x10c   :  { %183 = vsyncpa [#allocation4], 1 }

</bundles_post_ra>
